<compile_context>
chip_gen: v5e
topology: v5e:2x2
jax: 0.10.0
libtpu: 0.0.40
codegen_flags: <defaults>
</compile_context>

<pallas_src>
import jax
import jax.numpy as jnp
from jax.experimental import pallas as pl
from jax.experimental.pallas import tpu as pltpu


def linear_tanh_kernel(w_ref, b_ref, xT_ref, oT_ref):
    # w_ref: SMEM (OUT, IN) f32, b_ref: SMEM (OUT,) f32
    # xT_ref: VMEM (IN, TB) f32, oT_ref: VMEM (OUT, TB) f32
    in_features = xT_ref.shape[0]
    out_features = oT_ref.shape[0]

    # Load each input-feature row once (lane-dense vectors of length TB).
    xs = [xT_ref[i, :] for i in range(in_features)]

    # Fully unrolled scalar*vector FMA chain on the VPU; tanh on the EUP.
    for o in range(out_features):
        y = xs[0] * w_ref[o, 0]
        for i in range(1, in_features):
            y = y + xs[i] * w_ref[o, i]
        oT_ref[o, :] = jnp.tanh(y + b_ref[o])


def linear_tanh(x, w, b, *, max_tb=4096):
    """x: (B, IN) f32, w: (OUT, IN) f32, b: (OUT,) f32 -> (B, OUT) f32."""
    B, IN = x.shape
    OUT, IN2 = w.shape
    assert IN == IN2 and b.shape == (OUT,)

    LANE = 128
    # Pad batch up to a lane-dense multiple of 128, then to a whole number of
    # tiles of width TB (TB itself a multiple of 128).
    b_pad = pl.cdiv(B, LANE) * LANE
    tb = min(max_tb, b_pad)
    b_pad = pl.cdiv(b_pad, tb) * tb
    num_tiles = b_pad // tb

    # Glue layout work in plain JAX: transpose to (IN, B) and zero-pad lanes.
    xT = jnp.zeros((IN, b_pad), x.dtype).at[:, :B].set(x.T)

    smem_spec = pl.BlockSpec(memory_space=pltpu.MemorySpace.SMEM)

    if num_tiles == 1:
        # Small batch: single invocation, no grid, whole arrays resident.
        yT = pl.pallas_call(
            linear_tanh_kernel,
            out_shape=jax.ShapeDtypeStruct((OUT, b_pad), x.dtype),
            in_specs=[
                smem_spec,                                        # w
                smem_spec,                                        # b
                pl.BlockSpec(memory_space=pltpu.MemorySpace.VMEM),  # xT
            ],
            out_specs=pl.BlockSpec(memory_space=pltpu.MemorySpace.VMEM),
        )(w, b, xT)
    else:
        # Large batch: tile the lane axis; batch axis is embarrassingly
        # parallel (megacore / dual-TC friendly on v7x).
        yT = pl.pallas_call(
            linear_tanh_kernel,
            out_shape=jax.ShapeDtypeStruct((OUT, b_pad), x.dtype),
            grid=(num_tiles,),
            in_specs=[
                smem_spec,                                        # w (replicated)
                smem_spec,                                        # b (replicated)
                pl.BlockSpec((IN, tb), lambda j: (0, j)),         # xT tile
            ],
            out_specs=pl.BlockSpec((OUT, tb), lambda j: (0, j)),
            compiler_params=pltpu.CompilerParams(
                dimension_semantics=("parallel",)),
        )(w, b, xT)

    # Back to the PyTorch (B, OUT) layout, dropping the lane padding.
    return yT[:, :B].T


if __name__ == "__main__":
    key = jax.random.PRNGKey(0)
    kx, kw, kb = jax.random.split(key, 3)

    IN_FEATURES, OUT_FEATURES = 3, 4
    BATCH = 8

    # Deterministic init mimicking torch.nn.Linear's U(-1/sqrt(in), 1/sqrt(in)).
    bound = 1.0 / (IN_FEATURES ** 0.5)
    w = jax.random.uniform(kw, (OUT_FEATURES, IN_FEATURES),
                           minval=-bound, maxval=bound, dtype=jnp.float32)
    b = jax.random.uniform(kb, (OUT_FEATURES,),
                           minval=-bound, maxval=bound, dtype=jnp.float32)
    x = jax.random.normal(kx, (BATCH, IN_FEATURES), dtype=jnp.float32)

    # Small-batch path (no grid).
    out = jax.block_until_ready(linear_tanh(x, w, b))
    ref = jnp.tanh(x @ w.T + b)
    assert out.shape == (BATCH, OUT_FEATURES)
    assert jnp.allclose(out, ref, atol=1e-5, rtol=1e-5)

    # Exercise the tiled (grid) path with a modest batch and small tiles.
    x_big = jax.random.normal(kx, (512, IN_FEATURES), dtype=jnp.float32)
    out_big = jax.block_until_ready(linear_tanh(x_big, w, b, max_tb=256))
    ref_big = jnp.tanh(x_big @ w.T + b)
    assert out_big.shape == (512, OUT_FEATURES)
    assert jnp.allclose(out_big, ref_big, atol=1e-5, rtol=1e-5)

    print("KERNEL_OK")
</pallas_src>

<mosaic_0001>
module attributes {stable_mosaic.version = 11 : i64} {
  func.func @linear_tanh_kernel(%arg0: memref<4x3xf32, #tpu.memory_space<smem>>, %arg1: memref<4xf32, #tpu.memory_space<smem>>, %arg2: memref<3x128xf32, #tpu.memory_space<vmem>>, %arg3: memref<4x128xf32, #tpu.memory_space<vmem>>) attributes {dimension_semantics = [], scalar_prefetch = 0 : i64, scratch_operands = 0 : i64, tpu.core_type = #tpu.core_type<tc>} {
    %c0 = arith.constant 0 : index
    %c0_0 = arith.constant 0 : index
    %0 = vector.load %arg2[%c0, %c0_0] : memref<3x128xf32, #tpu.memory_space<vmem>>, vector<1x128xf32>
    %1 = vector.shape_cast %0 : vector<1x128xf32> to vector<128xf32>
    %c1 = arith.constant 1 : index
    %c0_1 = arith.constant 0 : index
    %2 = vector.load %arg2[%c1, %c0_1] : memref<3x128xf32, #tpu.memory_space<vmem>>, vector<1x128xf32>
    %3 = vector.shape_cast %2 : vector<1x128xf32> to vector<128xf32>
    %c2 = arith.constant 2 : index
    %c0_2 = arith.constant 0 : index
    %4 = vector.load %arg2[%c2, %c0_2] : memref<3x128xf32, #tpu.memory_space<vmem>>, vector<1x128xf32>
    %5 = vector.shape_cast %4 : vector<1x128xf32> to vector<128xf32>
    %c0_3 = arith.constant 0 : index
    %c0_4 = arith.constant 0 : index
    %6 = memref.load %arg0[%c0_3, %c0_4] : memref<4x3xf32, #tpu.memory_space<smem>>
    %7 = vector.broadcast %6 : f32 to vector<128xf32>
    %8 = arith.mulf %1, %7 : vector<128xf32>
    %c0_5 = arith.constant 0 : index
    %c1_6 = arith.constant 1 : index
    %9 = memref.load %arg0[%c0_5, %c1_6] : memref<4x3xf32, #tpu.memory_space<smem>>
    %10 = vector.broadcast %9 : f32 to vector<128xf32>
    %11 = arith.mulf %3, %10 : vector<128xf32>
    %12 = arith.addf %8, %11 : vector<128xf32>
    %c0_7 = arith.constant 0 : index
    %c2_8 = arith.constant 2 : index
    %13 = memref.load %arg0[%c0_7, %c2_8] : memref<4x3xf32, #tpu.memory_space<smem>>
    %14 = vector.broadcast %13 : f32 to vector<128xf32>
    %15 = arith.mulf %5, %14 : vector<128xf32>
    %16 = arith.addf %12, %15 : vector<128xf32>
    %c0_9 = arith.constant 0 : index
    %17 = memref.load %arg1[%c0_9] : memref<4xf32, #tpu.memory_space<smem>>
    %18 = vector.broadcast %17 : f32 to vector<128xf32>
    %19 = arith.addf %16, %18 : vector<128xf32>
    %20 = math.tanh %19 : vector<128xf32>
    %c0_10 = arith.constant 0 : index
    %c0_11 = arith.constant 0 : index
    %21 = vector.load %arg3[%c0_10, %c0_11] : memref<4x128xf32, #tpu.memory_space<vmem>>, vector<1x128xf32>
    %22 = vector.shape_cast %21 : vector<1x128xf32> to vector<128xf32>
    %23 = vector.shape_cast %20 : vector<128xf32> to vector<1x128xf32>
    tpu.vector_store %arg3[%c0_10, %c0_11], %23 {strides = array<i32>} : memref<4x128xf32, #tpu.memory_space<vmem>>, vector<1x128xf32>,
    %c1_12 = arith.constant 1 : index
    %c0_13 = arith.constant 0 : index
    %24 = memref.load %arg0[%c1_12, %c0_13] : memref<4x3xf32, #tpu.memory_space<smem>>
    %25 = vector.broadcast %24 : f32 to vector<128xf32>
    %26 = arith.mulf %1, %25 : vector<128xf32>
    %c1_14 = arith.constant 1 : index
    %c1_15 = arith.constant 1 : index
    %27 = memref.load %arg0[%c1_14, %c1_15] : memref<4x3xf32, #tpu.memory_space<smem>>
    %28 = vector.broadcast %27 : f32 to vector<128xf32>
    %29 = arith.mulf %3, %28 : vector<128xf32>
    %30 = arith.addf %26, %29 : vector<128xf32>
    %c1_16 = arith.constant 1 : index
    %c2_17 = arith.constant 2 : index
    %31 = memref.load %arg0[%c1_16, %c2_17] : memref<4x3xf32, #tpu.memory_space<smem>>
    %32 = vector.broadcast %31 : f32 to vector<128xf32>
    %33 = arith.mulf %5, %32 : vector<128xf32>
    %34 = arith.addf %30, %33 : vector<128xf32>
    %c1_18 = arith.constant 1 : index
    %35 = memref.load %arg1[%c1_18] : memref<4xf32, #tpu.memory_space<smem>>
    %36 = vector.broadcast %35 : f32 to vector<128xf32>
    %37 = arith.addf %34, %36 : vector<128xf32>
    %38 = math.tanh %37 : vector<128xf32>
    %c1_19 = arith.constant 1 : index
    %c0_20 = arith.constant 0 : index
    %39 = vector.load %arg3[%c1_19, %c0_20] : memref<4x128xf32, #tpu.memory_space<vmem>>, vector<1x128xf32>
    %40 = vector.shape_cast %39 : vector<1x128xf32> to vector<128xf32>
    %41 = vector.shape_cast %38 : vector<128xf32> to vector<1x128xf32>
    tpu.vector_store %arg3[%c1_19, %c0_20], %41 {strides = array<i32>} : memref<4x128xf32, #tpu.memory_space<vmem>>, vector<1x128xf32>,
    %c2_21 = arith.constant 2 : index
    %c0_22 = arith.constant 0 : index
    %42 = memref.load %arg0[%c2_21, %c0_22] : memref<4x3xf32, #tpu.memory_space<smem>>
    %43 = vector.broadcast %42 : f32 to vector<128xf32>
    %44 = arith.mulf %1, %43 : vector<128xf32>
    %c2_23 = arith.constant 2 : index
    %c1_24 = arith.constant 1 : index
    %45 = memref.load %arg0[%c2_23, %c1_24] : memref<4x3xf32, #tpu.memory_space<smem>>
    %46 = vector.broadcast %45 : f32 to vector<128xf32>
    %47 = arith.mulf %3, %46 : vector<128xf32>
    %48 = arith.addf %44, %47 : vector<128xf32>
    %c2_25 = arith.constant 2 : index
    %c2_26 = arith.constant 2 : index
    %49 = memref.load %arg0[%c2_25, %c2_26] : memref<4x3xf32, #tpu.memory_space<smem>>
    %50 = vector.broadcast %49 : f32 to vector<128xf32>
    %51 = arith.mulf %5, %50 : vector<128xf32>
    %52 = arith.addf %48, %51 : vector<128xf32>
    %c2_27 = arith.constant 2 : index
    %53 = memref.load %arg1[%c2_27] : memref<4xf32, #tpu.memory_space<smem>>
    %54 = vector.broadcast %53 : f32 to vector<128xf32>
    %55 = arith.addf %52, %54 : vector<128xf32>
    %56 = math.tanh %55 : vector<128xf32>
    %c2_28 = arith.constant 2 : index
    %c0_29 = arith.constant 0 : index
    %57 = vector.load %arg3[%c2_28, %c0_29] : memref<4x128xf32, #tpu.memory_space<vmem>>, vector<1x128xf32>
    %58 = vector.shape_cast %57 : vector<1x128xf32> to vector<128xf32>
    %59 = vector.shape_cast %56 : vector<128xf32> to vector<1x128xf32>
    tpu.vector_store %arg3[%c2_28, %c0_29], %59 {strides = array<i32>} : memref<4x128xf32, #tpu.memory_space<vmem>>, vector<1x128xf32>,
    %c3 = arith.constant 3 : index
    %c0_30 = arith.constant 0 : index
    %60 = memref.load %arg0[%c3, %c0_30] : memref<4x3xf32, #tpu.memory_space<smem>>
    %61 = vector.broadcast %60 : f32 to vector<128xf32>
    %62 = arith.mulf %1, %61 : vector<128xf32>
    %c3_31 = arith.constant 3 : index
    %c1_32 = arith.constant 1 : index
    %63 = memref.load %arg0[%c3_31, %c1_32] : memref<4x3xf32, #tpu.memory_space<smem>>
    %64 = vector.broadcast %63 : f32 to vector<128xf32>
    %65 = arith.mulf %3, %64 : vector<128xf32>
    %66 = arith.addf %62, %65 : vector<128xf32>
    %c3_33 = arith.constant 3 : index
    %c2_34 = arith.constant 2 : index
    %67 = memref.load %arg0[%c3_33, %c2_34] : memref<4x3xf32, #tpu.memory_space<smem>>
    %68 = vector.broadcast %67 : f32 to vector<128xf32>
    %69 = arith.mulf %5, %68 : vector<128xf32>
    %70 = arith.addf %66, %69 : vector<128xf32>
    %c3_35 = arith.constant 3 : index
    %71 = memref.load %arg1[%c3_35] : memref<4xf32, #tpu.memory_space<smem>>
    %72 = vector.broadcast %71 : f32 to vector<128xf32>
    %73 = arith.addf %70, %72 : vector<128xf32>
    %74 = math.tanh %73 : vector<128xf32>
    %c3_36 = arith.constant 3 : index
    %c0_37 = arith.constant 0 : index
    %75 = vector.load %arg3[%c3_36, %c0_37] : memref<4x128xf32, #tpu.memory_space<vmem>>, vector<1x128xf32>
    %76 = vector.shape_cast %75 : vector<1x128xf32> to vector<128xf32>
    %77 = vector.shape_cast %74 : vector<128xf32> to vector<1x128xf32>
    tpu.vector_store %arg3[%c3_36, %c0_37], %77 {strides = array<i32>} : memref<4x128xf32, #tpu.memory_space<vmem>>, vector<1x128xf32>,
    return
  }
}

</mosaic_0001>

<bundles_post_ra>
// kernel: tpu_custom_call.1
= control target key start
LH: loop header
LB: loop body
LE: loop exit
PB: predicated region body
PF: predicated region fallthrough
CT: control target
= control target key end

     0   :  { %8 = vsyncpa [#allocation5], 0  ;;  %s288_s0 = inlined_call_operand.hbm [shape: f32[4,3], index: 0, kind: input, shape index: {}]   ;;  %s289_s1 = inlined_call_operand.hbm [shape: f32[4], index: 1, kind: input, shape index: {}]   ;;  %s290_s2 = inlined_call_operand.hbm [shape: f32[3,128], index: 2, kind: input, shape index: {}]   ;;  %s291_s3 = inlined_call_operand.hbm [shape: f32[4,128], index: 3, kind: output, shape index: {}]  }
   0x1   :  { %9 = vsyncpa [#allocation7], 0 }
   0x2   :  { %10 = vsyncpa [#allocation3], 0 }
   0x3   :  { %11 = vsyncpa [#allocation4], 0  ;;  %s17_s14 = sshll.u32 %s288_s0, 4  ;;  %s26_s17 = sshll.u32 %s289_s1, 4  ;;  %s18_s14 = int_to_ptr.hbm [resolvable:$true] %s17_s14  ;;  %s27_s17 = int_to_ptr.hbm [resolvable:$true] %s26_s17 }
   0x4   :  { %s246_s18 = smov [#allocation2]   ;;  %s247_s19 = smov [#allocation6]  }
   0x5   :  { %20 = dma.hbm_to_smem %s18_s14, 64, %s246_s18, [#allocation5]  }
   0x6   :  { %29 = dma.hbm_to_smem %s27_s17, 16, %s247_s19, [#allocation7]  }
   0x7   :  { %s35_s22 = sshll.u32 %s290_s2, 4  ;;  %s248_s23 = smov [#allocation8]   ;;  %s36_s22 = int_to_ptr.hbm [resolvable:$true] %s35_s22 }
   0x8   :  { %s37_s24 = sshll.u32 %s248_s23, 4  ;;  %s38_s24 = int_to_ptr.vmem [resolvable:$true] %s37_s24 }
   0x9   :  { %40 = dma.hbm_to_vmem [thread:$0]  %s36_s22, 64, %s38_s24, [#allocation3]  }
   0xa   :  { %238 = dma.done.wait [#allocation5], 64  }
   0xb   :  { %239 = vsyncadd [#allocation5], 4294967232 }
   0xc   :  { %240 = dma.done.wait [#allocation7], 16  }
   0xd   :  { %241 = vsyncadd [#allocation7], 4294967280 }
   0xe   :  { %242 = dma.done.wait [#allocation3], 64  }
   0xf   :  { %243 = vsyncadd [#allocation3], 4294967232 }
  0x10   :  { %53 = sfence }
  0x11   :  { %s57_s0 = sld [smem:[#allocation2]]  ;;  %v54_v0 = vld [vmem:[#allocation8] sm:$0x1]  ;;  %v55_v1 = vld [vmem:[#allocation8 + $0x1] sm:$0x1]  ;;  %s249_s11 = smov [#allocation9]  }
  0x12   :  { %s140_s1 = sld [smem:[#allocation2 + $0x1]]  ;;  %v56_v2 = vld [vmem:[#allocation8 + $0x2] sm:$0x1]  ;;  %s126_s12 = sshll.u32 %s249_s11, 4  ;;  %s127_s12 = int_to_ptr.vmem [resolvable:$true] %s126_s12 }
  0x13   :  { %s141_s25 = sld [smem:[#allocation2 + $0x2]]  ;;  %s128_s15 = sshll.u32 %s291_s3, 4  ;;  %s129_s15 = int_to_ptr.hbm [resolvable:$true] %s128_s15 }
  0x14   :  { %s68_s26 = sld [smem:[#allocation6]] }
  0x15   :  { %s142_s27 = sld [smem:[#allocation2 + $0x80]] }
  0x16   :  { %s143_s2 = sld [smem:[#allocation2 + $0x81]] }
  0x17   :  { %v58_v3 = vstv %s57_s0  ;;  %s144_s28 = sld [smem:[#allocation2 + $0x82]] }
  0x18   :  { %v59_v4 = vmul.f32 %v58_v3, %v54_v0  ;;  %v61_v5 = vstv %s140_s1  ;;  %s279_s29 = sld [smem:[#allocation6 + $0x1]] }
  0x19   :  { %v62_v6 = vmul.f32 %v61_v5, %v55_v1  ;;  %v65_v7 = vstv %s141_s25  ;;  %s146_s30 = sld [smem:[#allocation2 + $0x100]] }
  0x1a   :  { %v66_v8 = vmul.f32 %v65_v7, %v56_v2  ;;  %s147_s4 = sld [smem:[#allocation2 + $0x101]]  ;;  %v69_v11 = vstv %s68_s26 }
  0x1b   :  { %v63_v9 = vadd.f32 %v62_v6, %v59_v4  ;;  %v74_v10 = vstv %s142_s27  ;;  %s148_s5 = sld [smem:[#allocation2 + $0x102]] }
  0x1c   :  { %v75_v12 = vmul.f32 %v74_v10, %v54_v0  ;;  %v77_v13 = vstv %s143_s2  ;;  %s281_s6 = sld [smem:[#allocation6 + $0x2]] }
  0x1d   :  { %v67_v14 = vadd.f32 %v66_v8, %v63_v9  ;;  %v78_v15 = vmul.f32 %v77_v13, %v55_v1  ;;  %v81_v16 = vstv %s144_s28  ;;  %s150_s7 = sld [smem:[#allocation2 + $0x180]] }
  0x1e   :  { %v82_v17 = vmul.f32 %v81_v16, %v56_v2  ;;  %s151_s8 = sld [smem:[#allocation2 + $0x181]]  ;;  %v85_v21 = vstv %s279_s29 }
  0x1f   :  { %v70_v18 = vadd.f32 %v69_v11, %v67_v14  ;;  %v79_v19 = vadd.f32 %v78_v15, %v75_v12  ;;  %v90_v20 = vstv %s146_s30  ;;  %s152_s9 = sld [smem:[#allocation2 + $0x182]] }
  0x20   :  { %v91_v22 = vmul.f32 %v90_v20, %v54_v0  ;;  %v93_v23 = vstv %s147_s4  ;;  %s153_s10 = sld [smem:[#allocation6 + $0x3]] }
  0x21   :  { %158 = vtanh.f32 %v70_v18  ;;  %v83_v24 = vadd.f32 %v82_v17, %v79_v19  ;;  %v94_v25 = vmul.f32 %v93_v23, %v55_v1  ;;  %v97_v26 = vstv %s148_s5 }
  0x22   :  { %v98_v27 = vmul.f32 %v97_v26, %v56_v2  ;;  %v101_v31 = vstv %s281_s6 }
  0x23   :  { %v86_v28 = vadd.f32 %v85_v21, %v83_v24  ;;  %v95_v29 = vadd.f32 %v94_v25, %v91_v22  ;;  %v106_v30 = vstv %s150_s7 }
  0x24   :  { %v107_v32 = vmul.f32 %v106_v30, %v54_v0  ;;  %v109_v33 = vstv %s151_s8 }
  0x25   :  { %160 = vtanh.f32 %v86_v28  ;;  %v99_v34 = vadd.f32 %v98_v27, %v95_v29  ;;  %v110_v35 = vmul.f32 %v109_v33, %v55_v1  ;;  %v113_v36 = vstv %s152_s9 }
  0x26   :  { %v114_v37 = vmul.f32 %v113_v36, %v56_v2  ;;  %v117_v41 = vstv %s153_s10 }
  0x27   :  { %v159_v38 = vpop.eup %158  ;;  %v102_v39 = vadd.f32 %v101_v31, %v99_v34  ;;  %v111_v40 = vadd.f32 %v110_v35, %v107_v32 }
  0x28   :  { %72 = vst [vmem:[#allocation9] sm:$0x1] %v159_v38 }
  0x29   :  { %162 = vtanh.f32 %v102_v39  ;;  %v115_v42 = vadd.f32 %v114_v37, %v111_v40 }
  0x2b   :  { %v161_v43 = vpop.eup %160  ;;  %v118_v44 = vadd.f32 %v117_v41, %v115_v42 }
  0x2c   :  { %88 = vst [vmem:[#allocation9 + $0x1] sm:$0x1] %v161_v43 }
  0x2d   :  { %164 = vtanh.f32 %v118_v44 }
  0x2f   :  { %v163_v45 = vpop.eup %162 }
  0x30   :  { %104 = vst [vmem:[#allocation9 + $0x2] sm:$0x1] %v163_v45 }
  0x33   :  { %v165_v46 = vpop.eup %164 }
  0x34   :  { %120 = vst [vmem:[#allocation9 + $0x3] sm:$0x1] %v165_v46 }
  0x35   :  { %131 = dma.vmem_to_hbm [thread:$0]  %s127_s12, 64, %s129_s15, [#allocation4]  }
  0x36   :  { %244 = dma.done.wait [#allocation4], 64  }
  0x37   :  { %245 = vsyncadd [#allocation4], 4294967232 }
  0x38   :  { %136 = vsyncpa [#allocation3], 1 }
  0x39   :  { %137 = vsyncpa [#allocation4], 1 }
  0x3a   :  { %138 = vsyncpa [#allocation5], 1 }
  0x3b   :  { %139 = vsyncpa [#allocation7], 1 }

</bundles_post_ra>
